<compile_context>
chip_gen: v7x
topology: tpu7x:2x2x1
jax: 0.10.0
libtpu: 0.0.40
codegen_flags: <defaults>
</compile_context>

<pallas_src>
import functools

import jax
import jax.numpy as jnp
from jax import lax
from jax.experimental import pallas as pl
from jax.experimental.pallas import tpu as pltpu


def _round_up(x, m):
    return (x + m - 1) // m * m


def _proxynca_kernel(x_ref, p_ref, lbl_ref, loss_ref, *, scale, c_true,
                     n_true, tile_rows):
    """One batch tile of ProxyNCA_prob.

    x_ref:    (TN, E_pad)   embedding tile (input dtype, zero padded)
    p_ref:    (C_pad, E_pad) proxies (resident across the grid, zero padded)
    lbl_ref:  (TN, 1) int32 class labels for this tile
    loss_ref: (TN, 1) f32 per-sample loss (0 for padded rows)
    """
    # --- L2 normalization: accumulate norms in f32, rsqrt on the EUP. ------
    x32 = x_ref[...].astype(jnp.float32)
    p32 = p_ref[...].astype(jnp.float32)
    # max(ss, 1e-24) == (max(||.||, 1e-12))^2  -> matches F.normalize eps.
    x_inv = lax.rsqrt(
        jnp.maximum(jnp.sum(x32 * x32, axis=-1, keepdims=True), 1e-24))
    p_inv = lax.rsqrt(
        jnp.maximum(jnp.sum(p32 * p32, axis=-1, keepdims=True), 1e-24))
    # Cast back to the input dtype so bf16 inputs take the native MXU path.
    x_hat = (x32 * x_inv).astype(x_ref.dtype)
    p_hat = (p32 * p_inv).astype(p_ref.dtype)

    # --- Pairwise squared distance via one MXU matmul. ---------------------
    # ||scale*x_hat|| == ||scale*p_hat|| == scale, hence
    #   D[i,j] = ||xn_i - pn_j||^2 = 2*scale^2 * max(0, 1 - <x_hat_i, p_hat_j>)
    # dot_general contracts the last dims of both operands -> no p_hat.T.
    cross = lax.dot_general(
        x_hat, p_hat,
        dimension_numbers=(((1,), (1,)), ((), ())),
        preferred_element_type=jnp.float32)                # (TN, C_pad)
    two_s2 = jnp.float32(2.0 * scale * scale)
    logits = -(two_s2 * jnp.maximum(1.0 - cross, 0.0))      # == -D

    # Mask padded proxy columns out of the softmax.
    col = lax.broadcasted_iota(jnp.int32, logits.shape, 1)
    logits = jnp.where(col < c_true, logits, jnp.float32(-1e30))

    # --- per-sample loss = logsumexp(logits) - logits[label]. --------------
    m = jnp.max(logits, axis=-1, keepdims=True)
    lse = m + jnp.log(jnp.sum(jnp.exp(logits - m), axis=-1, keepdims=True))
    labels = lbl_ref[...]                                   # (TN, 1) int32
    tgt = jnp.sum(jnp.where(col == labels, logits, 0.0), axis=-1,
                  keepdims=True)
    per_sample = lse - tgt                                  # (TN, 1)

    # Zero padded batch rows; the wrapper divides by the true N.
    row = (pl.program_id(0) * tile_rows
           + lax.broadcasted_iota(jnp.int32, per_sample.shape, 0))
    loss_ref[...] = jnp.where(row < n_true, per_sample, 0.0)


def proxynca_prob_loss(X, T_labels, proxies, *, nb_classes, scale, low,
                       tile_rows=128):
    """JAX wrapper mirroring ProxyNCA_prob.forward(X, T, low)."""
    P = proxies if low else proxies[:nb_classes]
    C = P.shape[0]
    N, E = X.shape

    # Lane/MXU-friendly padding: last dims multiples of 128, batch a multiple
    # of the tile.  Zero padding is exact for norms and dot products; padded
    # classes / rows are masked inside the kernel.
    e_pad = _round_up(E, 128)
    c_pad = _round_up(C, 128)
    tn = _round_up(min(tile_rows, _round_up(N, 8)), 8)
    n_pad = _round_up(N, tn)

    x_p = jnp.zeros((n_pad, e_pad), X.dtype).at[:N, :E].set(X)
    p_p = jnp.zeros((c_pad, e_pad), P.dtype).at[:C, :E].set(P)
    lbl = jnp.zeros((n_pad, 1), jnp.int32).at[:N, 0].set(
        T_labels.astype(jnp.int32))

    kernel = functools.partial(
        _proxynca_kernel, scale=float(scale), c_true=C, n_true=N,
        tile_rows=tn)

    per_sample = pl.pallas_call(
        kernel,
        out_shape=jax.ShapeDtypeStruct((n_pad, 1), jnp.float32),
        grid=(n_pad // tn,),
        in_specs=[
            pl.BlockSpec((tn, e_pad), lambda i: (i, 0)),      # X tile
            pl.BlockSpec((c_pad, e_pad), lambda i: (0, 0)),   # resident P
            pl.BlockSpec((tn, 1), lambda i: (i, 0)),          # int32 labels
        ],
        out_specs=pl.BlockSpec((tn, 1), lambda i: (i, 0)),
        compiler_params=pltpu.CompilerParams(
            dimension_semantics=("parallel",)),
    )(x_p, p_p, lbl)

    return jnp.sum(per_sample) / jnp.float32(N)


def _reference_loss(X, T_labels, proxies, *, nb_classes, scale, low):
    """Pure-JAX reference of the PyTorch forward, for verification."""
    P = proxies if low else proxies[:nb_classes]
    C = P.shape[0]
    xn = scale * X / jnp.maximum(
        jnp.linalg.norm(X, axis=-1, keepdims=True), 1e-12)
    pn = scale * P / jnp.maximum(
        jnp.linalg.norm(P, axis=-1, keepdims=True), 1e-12)
    d = (jnp.sum(xn * xn, -1, keepdims=True)
         + jnp.sum(pn * pn, -1, keepdims=True).T
         - 2.0 * xn @ pn.T)
    d = jnp.maximum(d, 0.0)
    logp = jax.nn.log_softmax(-d, axis=-1)
    T = jax.nn.one_hot(T_labels, C, dtype=jnp.float32)
    return jnp.mean(jnp.sum(-T * logp, axis=-1))


if __name__ == "__main__":
    nb_classes = 8
    sz_embed = 32
    scale = 3.0
    batch = 8

    key = jax.random.PRNGKey(0)
    k_prox, k_x, k_t = jax.random.split(key, 3)

    # torch.randn(2*nb_classes, sz_embed) / 8 (deterministic synthetic init)
    proxies = jax.random.normal(
        k_prox, (2 * nb_classes, sz_embed), dtype=jnp.float32) / 8.0
    X = jax.random.normal(k_x, (batch, sz_embed), dtype=jnp.float32)

    ok = True
    for low in (False, True):
        C = 2 * nb_classes if low else nb_classes
        T_labels = jax.random.randint(k_t, (batch,), 0, C, dtype=jnp.int32)

        loss = jax.block_until_ready(
            proxynca_prob_loss(X, T_labels, proxies,
                               nb_classes=nb_classes, scale=scale, low=low))
        ref = jax.block_until_ready(
            _reference_loss(X, T_labels, proxies,
                            nb_classes=nb_classes, scale=scale, low=low))

        if not jnp.allclose(loss, ref, rtol=1e-4, atol=1e-4):
            ok = False
            print(f"MISMATCH low={low}: kernel={loss} ref={ref}")

    if ok:
        print("KERNEL_OK")
</pallas_src>

<mosaic_0001>
module attributes {stable_mosaic.version = 11 : i64} {
  func.func @_proxynca_kernel(%arg0: i32, %arg1: memref<8x128xf32, #tpu.memory_space<vmem>>, %arg2: memref<128x128xf32, #tpu.memory_space<vmem>>, %arg3: memref<8x1xi32, #tpu.memory_space<vmem>>, %arg4: memref<8x1xf32, #tpu.memory_space<vmem>>) attributes {dimension_semantics = [#tpu.dimension_semantics<parallel>], iteration_bounds = array<i64: 1>, scalar_prefetch = 0 : i64, scratch_operands = 0 : i64, tpu.core_type = #tpu.core_type<tc>, window_params = [{transform_indices = @transform_0, window_bounds = array<i64: 8, 128>}, {pipeline_mode = #tpu.pipeline_mode<synchronous>, transform_indices = @transform_1, window_bounds = array<i64: 128, 128>}, {transform_indices = @transform_2, window_bounds = array<i64: 8, 1>}, {transform_indices = @transform_3, window_bounds = array<i64: 8, 1>}]} {
    %c0 = arith.constant 0 : index
    %c0_0 = arith.constant 0 : index
    %0 = vector.load %arg1[%c0, %c0_0] : memref<8x128xf32, #tpu.memory_space<vmem>>, vector<8x128xf32>
    %c0_1 = arith.constant 0 : index
    %c0_2 = arith.constant 0 : index
    %1 = vector.load %arg2[%c0_1, %c0_2] : memref<128x128xf32, #tpu.memory_space<vmem>>, vector<128x128xf32>
    %2 = arith.mulf %0, %0 : vector<8x128xf32>
    %cst = arith.constant dense<0.000000e+00> : vector<8xf32>
    %3 = vector.multi_reduction <add>, %2, %cst [1] : vector<8x128xf32> to vector<8xf32>
    %4 = vector.shape_cast %3 : vector<8xf32> to vector<8x1xf32>
    %cst_3 = arith.constant 1.000000e-24 : f32
    %5 = vector.broadcast %cst_3 : f32 to vector<8x1xf32>
    %6 = arith.maximumf %4, %5 : vector<8x1xf32>
    %7 = math.rsqrt %6 : vector<8x1xf32>
    %8 = arith.mulf %1, %1 : vector<128x128xf32>
    %cst_4 = arith.constant dense<0.000000e+00> : vector<128xf32>
    %9 = vector.multi_reduction <add>, %8, %cst_4 [1] : vector<128x128xf32> to vector<128xf32>
    %10 = vector.shape_cast %9 : vector<128xf32> to vector<128x1xf32>
    %cst_5 = arith.constant 1.000000e-24 : f32
    %11 = vector.broadcast %cst_5 : f32 to vector<128x1xf32>
    %12 = arith.maximumf %10, %11 : vector<128x1xf32>
    %13 = math.rsqrt %12 : vector<128x1xf32>
    %14 = vector.broadcast %7 : vector<8x1xf32> to vector<8x128xf32>
    %15 = arith.mulf %0, %14 : vector<8x128xf32>
    %16 = vector.broadcast %13 : vector<128x1xf32> to vector<128x128xf32>
    %17 = arith.mulf %1, %16 : vector<128x128xf32>
    %cst_6 = arith.constant dense<0.000000e+00> : vector<8x128xf32>
    %18 = tpu.matmul %15, %17, %cst_6 {dimension_numbers = #tpu.dot_dimension_numbers<[1], [1], [0], [0], [0, 0, 1, 0], [], []>} : vector<8x128xf32>, vector<128x128xf32>, vector<8x128xf32> -> vector<8x128xf32>
    %cst_7 = arith.constant 1.000000e+00 : f32
    %19 = vector.broadcast %cst_7 : f32 to vector<8x128xf32>
    %20 = arith.subf %19, %18 : vector<8x128xf32>
    %cst_8 = arith.constant 0.000000e+00 : f32
    %21 = vector.broadcast %cst_8 : f32 to vector<8x128xf32>
    %22 = arith.maximumf %20, %21 : vector<8x128xf32>
    %cst_9 = arith.constant 1.800000e+01 : f32
    %23 = vector.broadcast %cst_9 : f32 to vector<8x128xf32>
    %24 = arith.mulf %23, %22 : vector<8x128xf32>
    %cst_10 = arith.constant 0.000000e+00 : f32
    %25 = vector.broadcast %cst_10 : f32 to vector<8x128xf32>
    %26 = arith.subf %25, %24 : vector<8x128xf32>
    %27 = tpu.iota {dimensions = array<i32: 1>} : vector<8x128xi32>
    %c8_i32 = arith.constant 8 : i32
    %28 = vector.broadcast %c8_i32 : i32 to vector<8x128xi32>
    %29 = arith.cmpi slt, %27, %28 : vector<8x128xi32>
    %cst_11 = arith.constant -1.000000e+30 : f32
    %30 = vector.broadcast %cst_11 : f32 to vector<8x128xf32>
    %31 = arith.select %29, %26, %30 : vector<8x128xi1>, vector<8x128xf32>
    %cst_12 = arith.constant dense<0xFF800000> : vector<8xf32>
    %32 = vector.multi_reduction <maximumf>, %31, %cst_12 [1] : vector<8x128xf32> to vector<8xf32>
    %33 = vector.shape_cast %32 : vector<8xf32> to vector<8x1xf32>
    %34 = vector.broadcast %33 : vector<8x1xf32> to vector<8x128xf32>
    %35 = arith.subf %31, %34 : vector<8x128xf32>
    %36 = math.exp %35 : vector<8x128xf32>
    %cst_13 = arith.constant dense<0.000000e+00> : vector<8xf32>
    %37 = vector.multi_reduction <add>, %36, %cst_13 [1] : vector<8x128xf32> to vector<8xf32>
    %38 = vector.shape_cast %37 : vector<8xf32> to vector<8x1xf32>
    %39 = math.log %38 : vector<8x1xf32>
    %40 = arith.addf %33, %39 : vector<8x1xf32>
    %c0_14 = arith.constant 0 : index
    %c0_15 = arith.constant 0 : index
    %41 = vector.load %arg3[%c0_14, %c0_15] : memref<8x1xi32, #tpu.memory_space<vmem>>, vector<8x1xi32>
    %42 = vector.broadcast %41 : vector<8x1xi32> to vector<8x128xi32>
    %43 = arith.cmpi eq, %27, %42 : vector<8x128xi32>
    %cst_16 = arith.constant 0.000000e+00 : f32
    %44 = vector.broadcast %cst_16 : f32 to vector<8x128xf32>
    %45 = arith.select %43, %31, %44 : vector<8x128xi1>, vector<8x128xf32>
    %cst_17 = arith.constant dense<0.000000e+00> : vector<8xf32>
    %46 = vector.multi_reduction <add>, %45, %cst_17 [1] : vector<8x128xf32> to vector<8xf32>
    %47 = vector.shape_cast %46 : vector<8xf32> to vector<8x1xf32>
    %48 = arith.subf %40, %47 : vector<8x1xf32>
    %c8_i32_18 = arith.constant 8 : i32
    %49 = arith.muli %arg0, %c8_i32_18 : i32
    %50 = tpu.iota {dimensions = array<i32: 0>} : vector<8x1xi32>
    %51 = vector.broadcast %49 : i32 to vector<8x1xi32>
    %52 = arith.addi %51, %50 : vector<8x1xi32>
    %c8_i32_19 = arith.constant 8 : i32
    %53 = vector.broadcast %c8_i32_19 : i32 to vector<8x1xi32>
    %54 = arith.cmpi slt, %52, %53 : vector<8x1xi32>
    %cst_20 = arith.constant 0.000000e+00 : f32
    %55 = vector.broadcast %cst_20 : f32 to vector<8x1xf32>
    %56 = arith.select %54, %48, %55 : vector<8x1xi1>, vector<8x1xf32>
    %c0_21 = arith.constant 0 : index
    %c0_22 = arith.constant 0 : index
    %57 = vector.load %arg4[%c0_21, %c0_22] : memref<8x1xf32, #tpu.memory_space<vmem>>, vector<8x1xf32>
    tpu.vector_store %arg4[%c0_21, %c0_22], %56 {strides = array<i32>} : memref<8x1xf32, #tpu.memory_space<vmem>>, vector<8x1xf32>,
    return
  }
  func.func @transform_0(%arg0: i32) -> (i32, i32) {
    %c0_i32 = arith.constant 0 : i32
    %c0_i32_0 = arith.constant 0 : i32
    return %arg0, %c0_i32 : i32, i32
  }
  func.func @transform_1(%arg0: i32) -> (i32, i32) {
    %c0_i32 = arith.constant 0 : i32
    %c0_i32_0 = arith.constant 0 : i32
    %c0_i32_1 = arith.constant 0 : i32
    return %c0_i32, %c0_i32_0 : i32, i32
  }
  func.func @transform_2(%arg0: i32) -> (i32, i32) {
    %c0_i32 = arith.constant 0 : i32
    %c0_i32_0 = arith.constant 0 : i32
    return %arg0, %c0_i32 : i32, i32
  }
  func.func @transform_3(%arg0: i32) -> (i32, i32) {
    %c0_i32 = arith.constant 0 : i32
    %c0_i32_0 = arith.constant 0 : i32
    return %arg0, %c0_i32 : i32, i32
  }
}

</mosaic_0001>

<bundles_post_ra>
// kernel: tpu_custom_call.1
= control target key start
LH: loop header
LB: loop body
LE: loop exit
PB: predicated region body
PF: predicated region fallthrough
CT: control target
= control target key end

     0   :  { %8 = vsyncpa [#allocation3], 0  ;;  %s404_s12 = smov [#allocation2]   ;;  %s545_s0 = inlined_call_operand.vmem [shape: f32[8,128], index: 0, kind: input, shape index: {}]   ;;  %s546_s1 = inlined_call_operand.hbm [shape: f32[128,128], index: 1, kind: input, shape index: {}]   ;;  %s547_s2 = inlined_call_operand.vmem [shape: s32[8,1], index: 2, kind: input, shape index: {}]   ;;  %s548_s3 = inlined_call_operand.vmem [shape: f32[8,1], index: 3, kind: output, shape index: {}]  }
   0x1   :  { %s16_s13 = sshll.u32 %s404_s12, 4  ;;  %s380_s16 = scalar_lea.hbm %s546_s1, 2048  ;;  %s17_s13 = int_to_ptr.vmem [resolvable:$true] %s16_s13 }
   0x2   :  { %p381_p0 = scmp.ne.s32.totalorder %s546_s1, %s380_s16  ;;  %p384_p1 = scmp.lt.u32.totalorder %s380_s16, %s546_s1 }
   0x4   :  { %p386_p2 = pnand %p384_p1, %p381_p0 }
   0x6   :  { %389 = shalt.err (!%p386_p2)
}
   0x7   :  { %s390_s21 = scalar_lea.vmem %s17_s13, 2048  ;;  %p395_p4 = scmp.lt.s32.totalorder %s17_s13, %s17_s13 }
   0x8   :  { %p391_p3 = scmp.ne.s32.totalorder %s17_s13, %s390_s21  ;;  %p396_p5 = scmp.lt.s32.totalorder %s390_s21, %s390_s21 }
   0xa   :  { %p397_p6 = por %p396_p5, %p395_p4 }
   0xc   :  { %p398_p7 = pnand %p397_p6, %p391_p3 }
   0xe   :  { %401 = shalt.err (!%p398_p7)
}
   0xf   :  { %s405_s22 = smov 128   ;;  %s406_s23 = smov 8  }
  0x10   :  { %22 = dma.hbm_to_vmem [thread:$0]  %s546_s1, 2048, %s17_s13, [#allocation3], %s405_s22, %s405_s22, %s406_s23  }
  0x11   :  { %402 = dma.done.wait [#allocation3], 2048  }
  0x12   :  { %403 = vsyncadd [#allocation3], 4294965248  ;;  %v443_v0 = vld [vmem:[#allocation2] sm:$0xff]  ;;  %v445_v1 = vld [vmem:[#allocation2 + $0x10] sm:$0xff]  ;;  %v407_v33 = vmov 0.0|0.0   ;;  %vm408_vm0 = vmmov 0  }
  0x13   :  { %v447_v2 = vld [vmem:[#allocation2 + $0x8] sm:$0xff]  ;;  %v50_v3 = vmul.f32 %v443_v0, %v443_v0  ;;  %v52_v4 = vmul.f32 %v445_v1, %v445_v1  ;;  %v453_v5 = vld [vmem:[#allocation2 + $0x18] sm:$0xff]  ;;  %v461_v9 = vld [vmem:[#allocation2 + $0x20] sm:$0xff]  ;;  %310 = vmatprep.subr.bf16.mxu0 %v407_v33  ;;  %v409_v35 = vmov 0.0   ;;  %v410_v37 = vmov 0  }
  0x14   :  { %v51_v6 = vmul.f32 %v447_v2, %v447_v2  ;;  %v53_v7 = vmul.f32 %v453_v5, %v453_v5  ;;  %v459_v8 = vld [vmem:[#allocation2 + $0x28] sm:$0xff]  ;;  %v54_v11 = vmul.f32 %v461_v9, %v461_v9  ;;  %v467_v12 = vld [vmem:[#allocation2 + $0x38] sm:$0xff]  ;;  %v469_v13 = vld [vmem:[#allocation2 + $0x30] sm:$0xff]  ;;  %307 = vmatprep.mubr.msk.f32.mxu0 %vm408_vm0, %v409_v35  ;;  %341 = vset.pattern.permute.xlu0 %v410_v37  ;;  %vm251_vm3 = vcmask 7168  }
  0x15   :  { %66 = vadd.xlane.f32.xlu0 %v50_v3  ;;  %70 = vadd.xlane.f32.xlu1 %v52_v4  ;;  %v55_v10 = vmul.f32 %v459_v8, %v459_v8  ;;  %v57_v14 = vmul.f32 %v467_v12, %v467_v12  ;;  %v56_v15 = vmul.f32 %v469_v13, %v469_v13  ;;  %v475_v16 = vld [vmem:[#allocation2 + $0x48] sm:$0xff]  ;;  %v477_v17 = vld [vmem:[#allocation2 + $0x40] sm:$0xff]  ;;  %v483_v20 = vld [vmem:[#allocation2 + $0x58] sm:$0xff] }
  0x16   :  { %v59_v18 = vmul.f32 %v475_v16, %v475_v16  ;;  %v58_v19 = vmul.f32 %v477_v17, %v477_v17  ;;  %v485_v21 = vld [vmem:[#allocation2 + $0x50] sm:$0xff]  ;;  %v61_v22 = vmul.f32 %v483_v20, %v483_v20  ;;  %v491_v24 = vld [vmem:[#allocation2 + $0x68] sm:$0xff]  ;;  %v493_v25 = vld [vmem:[#allocation2 + $0x60] sm:$0xff] }
  0x17   :  { %v60_v23 = vmul.f32 %v485_v21, %v485_v21  ;;  %v63_v26 = vmul.f32 %v491_v24, %v491_v24  ;;  %v62_v27 = vmul.f32 %v493_v25, %v493_v25  ;;  %v499_v28 = vld [vmem:[#allocation2 + $0x78] sm:$0xff]  ;;  %v501_v29 = vld [vmem:[#allocation2 + $0x70] sm:$0xff]  ;;  %v510_v32 = vld [vmem:[%s545_s0] sm:$0xff] }
  0x18   :  { %v65_v30 = vmul.f32 %v499_v28, %v499_v28  ;;  %v64_v31 = vmul.f32 %v501_v29, %v501_v29  ;;  %v45_v34 = vmul.f32 %v510_v32, %v510_v32  ;;  %v235_v36 = vld [vmem:[%s547_s2] sm:$0xff] }
  0x19   :  { %68 = vadd.xlane.f32.xlu0 %v51_v6  ;;  %72 = vadd.xlane.f32.xlu1 %v53_v7 }
  0x1d   :  { %76 = vadd.xlane.f32.xlu1 %v55_v10  ;;  %74 = vadd.xlane.f32.xlu0 %v54_v11 }
  0x21   :  { %80 = vadd.xlane.f32.xlu1 %v57_v14  ;;  %78 = vadd.xlane.f32.xlu0 %v56_v15 }
  0x25   :  { %84 = vadd.xlane.f32.xlu1 %v59_v18  ;;  %82 = vadd.xlane.f32.xlu0 %v58_v19 }
  0x29   :  { %88 = vadd.xlane.f32.xlu1 %v61_v22  ;;  %86 = vadd.xlane.f32.xlu0 %v60_v23 }
  0x2d   :  { %92 = vadd.xlane.f32.xlu1 %v63_v26  ;;  %90 = vadd.xlane.f32.xlu0 %v62_v27 }
  0x31   :  { %96 = vadd.xlane.f32.xlu1 %v65_v30  ;;  %94 = vadd.xlane.f32.xlu0 %v64_v31 }
  0x35   :  { %46 = vadd.xlane.f32.xlu0 %v45_v34 }
  0x4b   :  { %237 = vperm.xlu0 %341, %v235_v36  }
  0xa2   :  { %v67_v38 = vpop.xlane.xlu0 %66  ;;  %v71_v39 = vpop.xlane.xlu1 %70 }
  0xa3   :  { %v98_v40 = vmax.f32 %v67_v38, 1e-24  ;;  %v100_v44 = vmax.f32 %v71_v39, 1e-24 }
  0xa5   :  { %342 = vrsqrt.f32 %v98_v40 }
  0xa6   :  { %v69_v41 = vpop.xlane.xlu0 %68  ;;  %v73_v42 = vpop.xlane.xlu1 %72 }
  0xa7   :  { %v99_v43 = vmax.f32 %v69_v41, 1e-24  ;;  %v101_v45 = vmax.f32 %v73_v42, 1e-24 }
  0xa9   :  { %344 = vrsqrt.f32 %v99_v43 }
  0xaa   :  { %v77_v46 = vpop.xlane.xlu1 %76  ;;  %346 = vrsqrt.f32 %v100_v44  ;;  %v75_v47 = vpop.xlane.xlu0 %74 }
  0xab   :  { %348 = vrsqrt.f32 %v101_v45  ;;  %v103_v48 = vmax.f32 %v77_v46, 1e-24  ;;  %v102_v49 = vmax.f32 %v75_v47, 1e-24 }
  0xad   :  { %350 = vrsqrt.f32 %v103_v48 }
  0xae   :  { %352 = vrsqrt.f32 %v102_v49  ;;  %v81_v52 = vpop.xlane.xlu1 %80  ;;  %v79_v55 = vpop.xlane.xlu0 %78 }
  0xaf   :  { %v343_v50 = vpop.eup %342  ;;  %v105_v58 = vmax.f32 %v81_v52, 1e-24  ;;  %v104_v60 = vmax.f32 %v79_v55, 1e-24 }
  0xb0   :  { %v131_v53 = vmul.f32 %v343_v50, %v443_v0 }
  0xb1   :  { %354 = vrsqrt.f32 %v105_v58 }
  0xb2   :  { %356 = vrsqrt.f32 %v104_v60  ;;  %v85_v63 = vpop.xlane.xlu1 %84  ;;  %v83_v0 = vpop.xlane.xlu0 %82 }
  0xb3   :  { %v345_v51 = vpop.eup %344  ;;  %v107_v6 = vmax.f32 %v85_v63, 1e-24  ;;  %v106_v7 = vmax.f32 %v83_v0, 1e-24 }
  0xb4   :  { %v132_v54 = vmul.f32 %v345_v51, %v447_v2  ;;  %v347_v56 = vpop.eup %346 }
  0xb5   :  { %v349_v59 = vpop.eup %348  ;;  %v133_v61 = vmul.f32 %v347_v56, %v445_v1  ;;  %358 = vrsqrt.f32 %v107_v6 }
  0xb6   :  { %v311_v57 = vpack.c.bf16 %v132_v54, %v131_v53  ;;  %v134_v62 = vmul.f32 %v349_v59, %v453_v5  ;;  %360 = vrsqrt.f32 %v106_v7  ;;  %v89_v1 = vpop.xlane.xlu1 %88  ;;  %v87_v15 = vpop.xlane.xlu0 %86 }
  0xb7   :  { %v351_v3 = vpop.eup %350  ;;  %v109_v19 = vmax.f32 %v89_v1, 1e-24  ;;  %v108_v22 = vmax.f32 %v87_v15, 1e-24 }
  0xb8   :  { %312 = vmatpush3.bf16.xpose.msra.mxu0 %v311_v57  ;;  %v353_v4 = vpop.eup %352  ;;  %v314_v2 = vpack.c.bf16 %v134_v62, %v133_v61  ;;  %v136_v11 = vmul.f32 %v351_v3, %v459_v8 }
  0xb9   :  { %313 = vmatprep.subr.bf16.mxu0 %v407_v33  ;;  %v135_v10 = vmul.f32 %v353_v4, %v461_v9  ;;  %362 = vrsqrt.f32 %v109_v19 }
  0xba   :  { %364 = vrsqrt.f32 %v108_v22  ;;  %v93_v8 = vpop.xlane.xlu1 %92  ;;  %v91_v30 = vpop.xlane.xlu0 %90 }
  0xbb   :  { %v355_v14 = vpop.eup %354  ;;  %v317_v5 = vpack.c.bf16 %v136_v11, %v135_v10  ;;  %v111_v34 = vmax.f32 %v93_v8, 1e-24  ;;  %v110_v35 = vmax.f32 %v91_v30, 1e-24 }
  0xbc   :  { %v357_v18 = vpop.eup %356  ;;  %v138_v26 = vmul.f32 %v355_v14, %v467_v12 }
  0xbd   :  { %v137_v23 = vmul.f32 %v357_v18, %v469_v13  ;;  %366 = vrsqrt.f32 %v111_v34 }
  0xbe   :  { %368 = vrsqrt.f32 %v110_v35  ;;  %v97_v12 = vpop.xlane.xlu1 %96  ;;  %v95_v39 = vpop.xlane.xlu0 %94 }
  0xbf   :  { %v359_v9 = vpop.eup %358  ;;  %v320_v27 = vpack.c.bf16 %v138_v26, %v137_v23  ;;  %v113_v41 = vmax.f32 %v97_v12, 1e-24  ;;  %v112_v42 = vmax.f32 %v95_v39, 1e-24 }
  0xc0   :  { %315 = vmatpush3.bf16.xpose.msra.mxu0 %v314_v2  ;;  %v361_v31 = vpop.eup %360  ;;  %v140_v37 = vmul.f32 %v359_v9, %v475_v16 }
  0xc1   :  { %316 = vmatprep.subr.bf16.mxu0 %v407_v33  ;;  %v139_v36 = vmul.f32 %v361_v31, %v477_v17  ;;  %370 = vrsqrt.f32 %v113_v41 }
  0xc2   :  { %372 = vrsqrt.f32 %v112_v42  ;;  %v47_v46 = vpop.xlane.xlu0 %46 }
  0xc3   :  { %v363_v13 = vpop.eup %362  ;;  %v323_v38 = vpack.c.bf16 %v140_v37, %v139_v36  ;;  %v48_v49 = vmax.f32 %v47_v46, 1e-24 }
  0xc4   :  { %v365_v40 = vpop.eup %364  ;;  %v142_v44 = vmul.f32 %v363_v13, %v483_v20 }
  0xc5   :  { %v141_v43 = vmul.f32 %v365_v40, %v485_v21  ;;  %374 = vrsqrt.f32 %v48_v49 }
  0xc7   :  { %v367_v16 = vpop.eup %366  ;;  %v326_v17 = vpack.c.bf16 %v142_v44, %v141_v43 }
  0xc8   :  { %318 = vmatpush3.bf16.xpose.msra.mxu0 %v317_v5  ;;  %v369_v45 = vpop.eup %368  ;;  %v144_v48 = vmul.f32 %v367_v16, %v491_v24  ;;  %v221_v24 = vlaneseq }
  0xc9   :  { %319 = vmatprep.subr.bf16.mxu0 %v407_v33  ;;  %v143_v47 = vmul.f32 %v369_v45, %v493_v25 }
  0xca   :  { %v222_v58 = vand.u32 127, %v221_v24  ;;  %v238_v63 = vpop.permute.xlu0 %237 }
  0xcb   :  { %v371_v50 = vpop.eup %370  ;;  %v329_v21 = vpack.c.bf16 %v144_v48, %v143_v47 }
  0xcc   :  { %v373_v51 = vpop.eup %372  ;;  %v146_v52 = vmul.f32 %v371_v50, %v499_v28  ;;  %vm223_vm1 = vcmp.lt.s32.totalorder %v222_v58, 8  ;;  %vm239_vm2 = vcmp.eq.s32.totalorder %v222_v58, %v238_v63 }
  0xcd   :  { %v145_v20 = vmul.f32 %v373_v51, %v501_v29 }
  0xcf   :  { %v332_v53 = vpack.c.bf16 %v146_v52, %v145_v20  ;;  %v375_v54 = vpop.eup %374 }
  0xd0   :  { %321 = vmatpush3.bf16.xpose.msra.mxu0 %v320_v27  ;;  %v130_v25 = vmul.f32 %v375_v54, %v510_v32 }
  0xd1   :  { %322 = vmatprep.subr.bf16.mxu0 %v407_v33 }
  0xd8   :  { %324 = vmatpush3.bf16.xpose.msra.mxu0 %v323_v38 }
  0xd9   :  { %325 = vmatprep.subr.bf16.mxu0 %v407_v33 }
  0xe0   :  { %327 = vmatpush3.bf16.xpose.msra.mxu0 %v326_v17 }
  0xe1   :  { %328 = vmatprep.subr.bf16.mxu0 %v407_v33 }
  0xe8   :  { %330 = vmatpush3.bf16.xpose.msra.mxu0 %v329_v21 }
  0xe9   :  { %331 = vmatprep.subr.bf16.mxu0 %v407_v33 }
  0xf0   :  { %333 = vmatpush3.bf16.xpose.msra.mxu0 %v332_v53 }
  0xf7   :  { %308 = vmatmul.mubr.f32.vlgmr.msra.gmra.mrb[0].mxu0 %v130_v25 }
 0x1ca   :  { %v213_v55 = vpop.f32.mrb[0].mxu0 }
 0x1cb   :  { %v217_v56 = vsub.f32 1.0, %v213_v55  ;;  %v309_v57 = vpop.f32.mrb[1].mxu0 }
 0x1cd   :  { %v218_v59 = vmax.f32 %v217_v56, 0.0 }
 0x1cf   :  { %v219_v60 = vmul.f32 18.0, %v218_v59 }
 0x1d1   :  { %v220_v61 = vsub.f32 0.0, %v219_v60 }
 0x1d3   :  { %v224_v29 = vsel %vm223_vm1, %v220_v61, -1e+30 }
 0x1d4   :  { %225 = vmax.xlane.f32.xlu1 %v224_v29  ;;  %v240_v32 = vsel %vm239_vm2, %v224_v29, 0.0 }
 0x261   :  { %v226_v28 = vpop.xlane.xlu1 %225 }
 0x262   :  { %v227_v62 = vsub.f32 %v224_v29, %v226_v28 }
 0x264   :  { %v228_v33 = vmul.f32 1.442695, %v227_v62 }
 0x266   :  { %376 = vpow2.f32 %v228_v33 }
 0x270   :  { %v377_v3 = vpop.eup %376 }
 0x271   :  { %230 = vadd.xlane.f32.xlu1 %v377_v3 }
 0x275   :  { %241 = vadd.xlane.f32.xlu1 %v240_v32 }
 0x2fe   :  { %v231_v0 = vpop.xlane.xlu1 %230 }
 0x2ff   :  { %378 = vlog2.f32 %v231_v0 }
 0x302   :  { %v242_v7 = vpop.xlane.xlu1 %241 }
 0x309   :  { %v379_v4 = vpop.eup %378 }
 0x30a   :  { %v233_v2 = vmul.f32 0.6931472, %v379_v4 }
 0x30c   :  { %v234_v6 = vadd.f32 %v233_v2, %v226_v28 }
 0x30e   :  { %v243_v10 = vsub.f32 %v234_v6, %v242_v7 }
 0x310   :  { %252 = vst.msk [vmem:[%s548_s3] sm:$0xff] %vm251_vm3, %v243_v10 }
 0x311   :  { %257 = vsyncpa [#allocation3], 1 }

</bundles_post_ra>
